<compile_context>
chip_gen: v5e
topology: v5e:2x2
jax: 0.10.0
libtpu: 0.0.40
codegen_flags: <defaults>
</compile_context>

<pallas_src>
import math
from functools import partial

import jax
import jax.numpy as jnp
from jax.experimental import pallas as pl
from jax.experimental.pallas import tpu as pltpu


def _rel_weights_kernel(w_ref, o_ref, *, scale, num_heads):
    # w_ref: (n_tables, k, d)  full tables, resident in VMEM
    # o_ref: (n_tables, k, num_heads * d)  lane-dense output slab
    scaled = w_ref[...] * scale
    # Head-wise "repeat" along the lane axis: out[t, i, h*d + j] = scaled[t, i, j]
    o_ref[...] = jnp.concatenate([scaled] * num_heads, axis=-1)


def get_rel_weights_pallas(stacked_weights, num_heads, d_model):
    """stacked_weights: (n_tables, k, d) -> (n_tables, 1, num_heads, k, d),
    each table scaled by sqrt(d_model) and repeated across heads."""
    n, k, d = stacked_weights.shape
    scale = math.sqrt(d_model)  # matches PyTorch: uses the d_model ctor arg

    slab = pl.pallas_call(
        partial(_rel_weights_kernel, scale=scale, num_heads=num_heads),
        out_shape=jax.ShapeDtypeStruct((n, k, num_heads * d),
                                       stacked_weights.dtype),
        in_specs=[pl.BlockSpec(memory_space=pltpu.MemorySpace.VMEM)],
        out_specs=pl.BlockSpec(memory_space=pltpu.MemorySpace.VMEM),
    )(stacked_weights)

    # Layout plumbing outside the kernel (tiny, cheap XLA ops):
    # (n, k, H*d) -> (n, k, H, d) -> (n, H, k, d) -> (n, 1, H, k, d)
    out = slab.reshape(n, k, num_heads, d)
    out = jnp.transpose(out, (0, 2, 1, 3))
    return out.reshape(n, 1, num_heads, k, d)


class RelEmbeddingsPallas:
    """JAX/Pallas equivalent of the PyTorch RelEmbeddings module (dropout=0.0)."""

    def __init__(self, d_model, num_heads, k, pos_type, key):
        self.d_model = d_model
        self.k = k + 1
        self.pos_type = pos_type
        self.num_heads = num_heads

        def init_table(subkey):
            # nn.Embedding default init: N(0, 1); padding_idx=0 -> row 0 zeroed.
            w = jax.random.normal(subkey, (self.k, d_model), dtype=jnp.float32)
            return w.at[0].set(0.0)

        keys = jax.random.split(key, 3)
        self.rel_emb_q = init_table(keys[0]) if 'p2q' in pos_type else None
        self.rel_emb_k = init_table(keys[1]) if 'p2k' in pos_type else None
        self.rel_emb_v = init_table(keys[2]) if 'p2v' in pos_type else None

    def forward(self):
        names = []
        tables = []
        if 'p2q' in self.pos_type:
            names.append('p2q'); tables.append(self.rel_emb_q)
        if 'p2k' in self.pos_type:
            names.append('p2k'); tables.append(self.rel_emb_k)
        if 'p2v' in self.pos_type:
            names.append('p2v'); tables.append(self.rel_emb_v)

        results = {'p2q': None, 'p2k': None, 'p2v': None}
        if tables:
            stacked = jnp.stack(tables, axis=0)  # (n_tables, k, d_model)
            fused = get_rel_weights_pallas(stacked, self.num_heads, self.d_model)
            for idx, name in enumerate(names):
                results[name] = fused[idx]       # (1, num_heads, k, d_model)
        return results['p2q'], results['p2k'], results['p2v']


if __name__ == "__main__":
    d_model = 32
    num_heads = 4     # num_heads * d_model = 128 -> exactly lane-dense output slab
    k = 8             # module uses k + 1 = 9 relative positions
    pos_type = "p2q_p2k_p2v"

    key = jax.random.PRNGKey(0)
    module = RelEmbeddingsPallas(d_model, num_heads, k, pos_type, key)

    rel_q, rel_k, rel_v = module.forward()
    jax.block_until_ready((rel_q, rel_k, rel_v))

    # reference check against plain-JAX semantics
    scale = math.sqrt(d_model)
    for w, out in ((module.rel_emb_q, rel_q),
                   (module.rel_emb_k, rel_k),
                   (module.rel_emb_v, rel_v)):
        ref = jnp.tile((w * scale)[None, None], (1, num_heads, 1, 1))
        assert out.shape == (1, num_heads, k + 1, d_model), out.shape
        assert jnp.allclose(out, ref, atol=1e-6), "mismatch vs reference"

    print("KERNEL_OK")
</pallas_src>

<mosaic_0001>
module attributes {stable_mosaic.version = 11 : i64} {
  func.func @_rel_weights_kernel(%arg0: memref<3x9x32xf32, #tpu.memory_space<vmem>>, %arg1: memref<3x9x128xf32, #tpu.memory_space<vmem>>) attributes {dimension_semantics = [], scalar_prefetch = 0 : i64, scratch_operands = 0 : i64, tpu.core_type = #tpu.core_type<tc>} {
    %c0 = arith.constant 0 : index
    %c0_0 = arith.constant 0 : index
    %c0_1 = arith.constant 0 : index
    %0 = vector.load %arg0[%c0, %c0_0, %c0_1] : memref<3x9x32xf32, #tpu.memory_space<vmem>>, vector<3x9x32xf32>
    %cst = arith.constant 5.65685415 : f32
    %1 = vector.broadcast %cst : f32 to vector<3x9x32xf32>
    %2 = arith.mulf %0, %1 : vector<3x9x32xf32>
    %3 = tpu.concatenate %2, %2, %2, %2 in 2 : vector<3x9x32xf32>, vector<3x9x32xf32>, vector<3x9x32xf32>, vector<3x9x32xf32> -> vector<3x9x128xf32>
    %c0_2 = arith.constant 0 : index
    %c0_3 = arith.constant 0 : index
    %c0_4 = arith.constant 0 : index
    %4 = vector.load %arg1[%c0_2, %c0_3, %c0_4] : memref<3x9x128xf32, #tpu.memory_space<vmem>>, vector<3x9x128xf32>
    tpu.vector_store %arg1[%c0_2, %c0_3, %c0_4], %3 {strides = array<i32>} : memref<3x9x128xf32, #tpu.memory_space<vmem>>, vector<3x9x128xf32>,
    return
  }
}

</mosaic_0001>

<bundles_post_ra>
// kernel: tpu_custom_call.1
= control target key start
LH: loop header
LB: loop body
LE: loop exit
PB: predicated region body
PF: predicated region fallthrough
CT: control target
= control target key end

     0   :  { %s114_s12 = smov 32   ;;  %s115_s19 = smov 64   ;;  %vm80_vm0 = vcmask 261120   ;;  %vm87_vm1 = vcmask 523264   ;;  %vm94_vm2 = vcmask 785408   ;;  %s187_s0 = inlined_call_operand.vmem [shape: f32[3,9,32], index: 0, kind: input, shape index: {}]   ;;  %s188_s1 = inlined_call_operand.vmem [shape: f32[3,9,128], index: 1, kind: output, shape index: {}]  }
   0x1   :  { %v12_v0 = vld [vmem:[%s187_s0 + $0x20] sm:$0xff]  ;;  %v10_v1 = vld [vmem:[%s187_s0 + $0x10] sm:$0xff]  ;;  %v13_v6 = vld [vmem:[%s187_s0 + $0x28] sm:$0x1]  ;;  %s116_s20 = smov 96  }
   0x2   :  { %v8_v2 = vld [vmem:[%s187_s0] sm:$0xff]  ;;  %v136_v3 = vmul.f32 5.656854, %v12_v0  ;;  %v16_v4 = vmul.f32 5.656854, %v10_v1 }
   0x3   :  { %v14_v5 = vmul.f32 5.656854, %v8_v2  ;;  %v11_v7 = vld [vmem:[%s187_s0 + $0x18] sm:$0x1]  ;;  %v9_v8 = vld [vmem:[%s187_s0 + $0x8] sm:$0x1] }
   0x4   :  { %34 = vrot.lane.b32.xlu2 %v136_v3, %s114_s12  ;;  %30 = vrot.lane.b32.xlu1 %v16_v4, %s114_s12  ;;  %v19_v9 = vmul.f32 5.656854, %v13_v6  ;;  %v17_v10 = vmul.f32 5.656854, %v11_v7  ;;  %v15_v11 = vmul.f32 5.656854, %v9_v8 }
   0x5   :  { %26 = vrot.lane.b32.xlu0 %v14_v5, %s114_s12 }
   0xc   :  { %36 = vrot.lane.b32.xlu2 %v19_v9, %s114_s12  ;;  %32 = vrot.lane.b32.xlu1 %v17_v10, %s114_s12 }
   0xd   :  { %28 = vrot.lane.b32.xlu0 %v15_v11, %s114_s12 }
  0x14   :  { %48 = vrot.lane.b32.xlu2 %v16_v4, %s115_s19  ;;  %46 = vrot.lane.b32.xlu1 %v15_v11, %s115_s19 }
  0x15   :  { %44 = vrot.lane.b32.xlu0 %v14_v5, %s115_s19 }
  0x1c   :  { %54 = vrot.lane.b32.xlu2 %v19_v9, %s115_s19  ;;  %52 = vrot.lane.b32.xlu1 %v136_v3, %s115_s19 }
  0x1d   :  { %50 = vrot.lane.b32.xlu0 %v17_v10, %s115_s19 }
  0x24   :  { %66 = vrot.lane.b32.xlu2 %v16_v4, %s116_s20  ;;  %64 = vrot.lane.b32.xlu1 %v15_v11, %s116_s20 }
  0x25   :  { %62 = vrot.lane.b32.xlu0 %v14_v5, %s116_s20 }
  0x2c   :  { %72 = vrot.lane.b32.xlu2 %v19_v9, %s116_s20  ;;  %70 = vrot.lane.b32.xlu1 %v136_v3, %s116_s20 }
  0x2d   :  { %68 = vrot.lane.b32.xlu0 %v17_v10, %s116_s20 }
  0x5e   :  { %v35_v12 = vpop.permute.xlu2 %34 }
  0x5f   :  { %v85_v40 = vsel %vm80_vm0, %v136_v3, %v35_v12 }
  0x66   :  { %v37_v13 = vpop.permute.xlu2 %36 }
  0x67   :  { %v86_v24 = vsel %vm80_vm0, %v19_v9, %v37_v13 }
  0x6e   :  { %v49_v14 = vpop.permute.xlu2 %48 }
  0x76   :  { %v55_v15 = vpop.permute.xlu2 %54  ;;  %v31_v16 = vpop.permute.xlu1 %30 }
  0x77   :  { %v27_v17 = vpop.permute.xlu0 %26  ;;  %v83_v18 = vsel %vm80_vm0, %v16_v4, %v31_v16  ;;  %v93_v25 = vsel %vm87_vm1, %v86_v24, %v55_v15 }
  0x78   :  { %v90_v20 = vsel %vm87_vm1, %v83_v18, %v49_v14  ;;  %v81_v33 = vsel %vm80_vm0, %v14_v5, %v27_v17 }
  0x7e   :  { %v67_v19 = vpop.permute.xlu2 %66  ;;  %v33_v21 = vpop.permute.xlu1 %32 }
  0x7f   :  { %v97_v22 = vsel %vm94_vm2, %v90_v20, %v67_v19  ;;  %v29_v23 = vpop.permute.xlu0 %28  ;;  %v84_v41 = vsel %vm80_vm0, %v17_v10, %v33_v21 }
  0x80   :  { %103 = vst [vmem:[%s188_s1 + $0x10] sm:$0xff] %v97_v22  ;;  %v82_v32 = vsel %vm80_vm0, %v15_v11, %v29_v23 }
  0x86   :  { %v73_v26 = vpop.permute.xlu2 %72  ;;  %v47_v27 = vpop.permute.xlu1 %46 }
  0x87   :  { %v100_v28 = vsel %vm94_vm2, %v93_v25, %v73_v26  ;;  %v45_v29 = vpop.permute.xlu0 %44  ;;  %v89_v34 = vsel %vm87_vm1, %v82_v32, %v47_v27 }
  0x88   :  { %106 = vst [vmem:[%s188_s1 + $0x28] sm:$0x1] %v100_v28  ;;  %v88_v36 = vsel %vm87_vm1, %v81_v33, %v45_v29 }
  0x8e   :  { %v53_v30 = vpop.permute.xlu1 %52 }
  0x8f   :  { %v51_v31 = vpop.permute.xlu0 %50  ;;  %v92_v42 = vsel %vm87_vm1, %v85_v40, %v53_v30 }
  0x90   :  { %v91_v44 = vsel %vm87_vm1, %v84_v41, %v51_v31 }
  0x96   :  { %v65_v35 = vpop.permute.xlu1 %64 }
  0x97   :  { %v96_v37 = vsel %vm94_vm2, %v89_v34, %v65_v35  ;;  %v63_v38 = vpop.permute.xlu0 %62 }
  0x98   :  { %102 = vst [vmem:[%s188_s1 + $0x8] sm:$0x1] %v96_v37  ;;  %v95_v39 = vsel %vm94_vm2, %v88_v36, %v63_v38 }
  0x99   :  { %101 = vst [vmem:[%s188_s1] sm:$0xff] %v95_v39 }
  0x9e   :  { %v71_v43 = vpop.permute.xlu1 %70 }
  0x9f   :  { %v99_v45 = vsel %vm94_vm2, %v92_v42, %v71_v43  ;;  %v69_v46 = vpop.permute.xlu0 %68 }
  0xa0   :  { %105 = vst [vmem:[%s188_s1 + $0x20] sm:$0xff] %v99_v45  ;;  %v98_v47 = vsel %vm94_vm2, %v91_v44, %v69_v46 }
  0xa1   :  { %104 = vst [vmem:[%s188_s1 + $0x18] sm:$0x1] %v98_v47 }

</bundles_post_ra>
